<compile_context>
chip_gen: v7x
topology: tpu7x:2x2x1
jax: 0.10.0
libtpu: 0.0.40
codegen_flags: <defaults>
</compile_context>

<pallas_src>
import jax
import jax.numpy as jnp
from jax import lax
from jax.experimental import pallas as pl
from jax.experimental.pallas import tpu as pltpu

LN_EPS = 1e-5       # PyTorch nn.LayerNorm default
LANE = 128
SUBLANE = 16        # bf16 sublane packing -> round batch tiles to 16


def _round_up(x, m):
    return (x + m - 1) // m * m


def _cdiv(a, b):
    return -(-a // b)


# ------------------------------------------------------------------ kernel ---

def _make_kernel(hidden_dim, hp):
    """Kernel with compile-time constants (true hidden width, padded hidden width)."""
    inv_h = 1.0 / float(hidden_dim)

    def kernel(obs_ref, act_ref, task_ref,
               wto_ref, wta_ref, bt_ref, g_ref, be_ref,
               wa_ref, ba_ref,
               wb1_ref, b1b_ref, wb2_ref, b2b_ref,
               out_ref):
        # trunk: Linear(concat(obs, act)) folded into two bf16 matmuls (f32 accumulate)
        h = (jnp.dot(obs_ref[...], wto_ref[...], preferred_element_type=jnp.float32)
             + jnp.dot(act_ref[...], wta_ref[...], preferred_element_type=jnp.float32)
             + bt_ref[...])

        # one-pass LayerNorm stats over the TRUE hidden width (padded columns of h are 0,
        # so they do not perturb the sums); clamp variance against f32 cancellation.
        s1 = jnp.sum(h, axis=-1, keepdims=True)
        s2 = jnp.sum(h * h, axis=-1, keepdims=True)
        mu = s1 * inv_h
        var = jnp.maximum(s2 * inv_h - mu * mu, 0.0)
        hn = (h - mu) * lax.rsqrt(var + LN_EPS)
        # padded gamma/beta are 0 -> padded hidden columns are exactly 0 after affine+tanh
        hn = jnp.tanh(hn * g_ref[...] + be_ref[...]).astype(jnp.bfloat16)

        # fused first head layer (dense column-concat of both heads), then ReLU
        z = jnp.dot(hn, wa_ref[...], preferred_element_type=jnp.float32) + ba_ref[...]
        z = jnp.maximum(z, 0.0).astype(jnp.bfloat16)
        z1 = z[:, :hp]          # lane-tile-aligned slices (hp is a multiple of 128)
        z2 = z[:, hp:]

        # second head layers kept SEPARATE (block-diagonal fusion is 2x wasted MXU/DMA)
        q1f = jnp.dot(z1, wb1_ref[...], preferred_element_type=jnp.float32) + b1b_ref[...]
        q2f = jnp.dot(z2, wb2_ref[...], preferred_element_type=jnp.float32) + b2b_ref[...]

        # einsum('bi,bi->b', task, q) per head; task is lane-padded with zeros, so the
        # full-width (tile-aligned) reduction is exact.
        t = task_ref[...].astype(jnp.float32)
        q1 = jnp.sum(t * q1f, axis=-1, keepdims=True)
        q2 = jnp.sum(t * q2f, axis=-1, keepdims=True)
        out_ref[...] = jnp.concatenate([q1, q2], axis=-1)
        # TODO(synk): a (2, TB) lane-dense output (in-kernel transpose) would remove the
        # ~TB/8 masked stores per tile; kept as (TB, 2) for lowering robustness.

    return kernel


# ------------------------------------------------------------- param packing ---

def pack_params(params, obs_dim, action_dim, hidden_dim, sf_dim):
    """Lane-pad, split, and (bf16) cast module parameters for the kernel. Done once."""
    hp = _round_up(hidden_dim, LANE)
    sp = _round_up(sf_dim, LANE)
    f32 = jnp.float32
    bf16 = jnp.bfloat16

    wt = params["wt"].astype(f32)                       # (obs_dim + action_dim, hidden)
    wto = jnp.zeros((obs_dim, hp), f32).at[:, :hidden_dim].set(wt[:obs_dim]).astype(bf16)
    wta = jnp.zeros((action_dim, hp), f32).at[:, :hidden_dim].set(wt[obs_dim:]).astype(bf16)
    bt = jnp.zeros((1, hp), f32).at[:, :hidden_dim].set(params["bt"].astype(f32))
    g = jnp.zeros((1, hp), f32).at[:, :hidden_dim].set(params["ln_g"].astype(f32))
    be = jnp.zeros((1, hp), f32).at[:, :hidden_dim].set(params["ln_b"].astype(f32))

    # fused first head layer: columns [0:hp) = head-1, [hp:2hp) = head-2 (dense fusion)
    wa = jnp.zeros((hp, 2 * hp), f32)
    wa = wa.at[:hidden_dim, :hidden_dim].set(params["w1a"].astype(f32))
    wa = wa.at[:hidden_dim, hp:hp + hidden_dim].set(params["w2a"].astype(f32))
    wa = wa.astype(bf16)
    ba = jnp.zeros((1, 2 * hp), f32)
    ba = ba.at[:, :hidden_dim].set(params["b1a"].astype(f32))
    ba = ba.at[:, hp:hp + hidden_dim].set(params["b2a"].astype(f32))

    # second head layers kept separate (no block-diagonal zero padding)
    wb1 = jnp.zeros((hp, sp), f32).at[:hidden_dim, :sf_dim].set(
        params["w1b"].astype(f32)).astype(bf16)
    wb2 = jnp.zeros((hp, sp), f32).at[:hidden_dim, :sf_dim].set(
        params["w2b"].astype(f32)).astype(bf16)
    b1b = jnp.zeros((1, sp), f32).at[:, :sf_dim].set(params["b1b"].astype(f32))
    b2b = jnp.zeros((1, sp), f32).at[:, :sf_dim].set(params["b2b"].astype(f32))

    return {"wto": wto, "wta": wta, "bt": bt, "g": g, "be": be,
            "wa": wa, "ba": ba, "wb1": wb1, "b1b": b1b, "wb2": wb2, "b2b": b2b,
            "hp": hp, "sp": sp}


# ------------------------------------------------------------------ wrapper ---

def critic_sf_forward(obs, action, task, packed, hidden_dim, block_b=512):
    """obs (B, obs_dim), action (B, action_dim), task (B, sf_dim) -> (q1, q2), each (B, 1)."""
    B, obs_dim = obs.shape
    action_dim = action.shape[1]
    hp, sp = packed["hp"], packed["sp"]

    # bf16 streams (halves per-row HBM traffic; matmuls accumulate in f32)
    obs = obs.astype(jnp.bfloat16)
    action = action.astype(jnp.bfloat16)
    task = task.astype(jnp.bfloat16)
    if task.shape[1] != sp:
        task = jnp.pad(task, ((0, 0), (0, sp - task.shape[1])))   # zero lane-pad

    # batch tiling:
    #  - at most block_b rows per tile; when B > block_b, split so per-tile pad <= 15 rows
    #  - force >= 2 grid steps when the batch is big enough, so v7x's 2nd TensorCore works
    n_steps = _cdiv(B, block_b)
    if n_steps < 2 and B >= 2 * LANE:
        n_steps = 2
    tb = _round_up(_cdiv(B, n_steps), SUBLANE)
    grid_b = _cdiv(B, tb)
    bp = grid_b * tb
    if bp != B:
        pad = bp - B
        obs = jnp.pad(obs, ((0, pad), (0, 0)))
        action = jnp.pad(action, ((0, pad), (0, 0)))
        task = jnp.pad(task, ((0, pad), (0, 0)))

    def row_spec(ncols):
        return pl.BlockSpec((tb, ncols), lambda i: (i, 0))

    def resident_spec(arr):
        # constant index_map -> block never changes -> weight stays VMEM-resident
        return pl.BlockSpec(arr.shape, lambda i: (0, 0))

    weights = (packed["wto"], packed["wta"], packed["bt"], packed["g"], packed["be"],
               packed["wa"], packed["ba"],
               packed["wb1"], packed["b1b"], packed["wb2"], packed["b2b"])

    in_specs = [row_spec(obs_dim), row_spec(action_dim), row_spec(sp)]
    in_specs += [resident_spec(w) for w in weights]

    # scoped-VMEM budget: (double-buffered) resident weights + streamed blocks + headroom
    # for the f32 intermediates (h, z, q1f, q2f).
    weight_bytes = sum(int(w.size) * w.dtype.itemsize for w in weights)
    stream_bytes = tb * (obs_dim + action_dim + sp) * 2 + tb * 2 * 4
    interm_bytes = tb * (hp + 2 * hp + 2 * sp) * 4
    vmem_limit = 2 * weight_bytes + 2 * stream_bytes + 2 * interm_bytes + (8 << 20)
    vmem_limit = max(int(vmem_limit), 32 << 20)

    out = pl.pallas_call(
        _make_kernel(hidden_dim, hp),
        out_shape=jax.ShapeDtypeStruct((bp, 2), jnp.float32),
        grid=(grid_b,),
        in_specs=in_specs,
        out_specs=pl.BlockSpec((tb, 2), lambda i: (i, 0)),
        compiler_params=pltpu.CompilerParams(
            dimension_semantics=("parallel",),
            vmem_limit_bytes=vmem_limit),
    )(obs, action, task, *weights)

    return out[:B, 0:1], out[:B, 1:2]


# -------------------------------------------------- synthetic params + reference ---

def init_params(key, obs_dim, action_dim, hidden_dim, sf_dim):
    """Deterministic synthetic parameters (module shapes; not a checkpoint load)."""
    in_dim = obs_dim + action_dim
    keys = jax.random.split(key, 6)

    def lin(k, fan_in, fan_out):
        w = jax.random.normal(k, (fan_in, fan_out), jnp.float32) / jnp.sqrt(fan_in)
        b = jnp.zeros((1, fan_out), jnp.float32)
        return w, b

    wt, bt = lin(keys[0], in_dim, hidden_dim)
    w1a, b1a = lin(keys[1], hidden_dim, hidden_dim)
    w1b, b1b = lin(keys[2], hidden_dim, sf_dim)
    w2a, b2a = lin(keys[3], hidden_dim, hidden_dim)
    w2b, b2b = lin(keys[4], hidden_dim, sf_dim)
    return {
        "wt": wt, "bt": bt,
        "ln_g": jnp.ones((1, hidden_dim), jnp.float32),
        "ln_b": jnp.zeros((1, hidden_dim), jnp.float32),
        "w1a": w1a, "b1a": b1a, "w1b": w1b, "b1b": b1b,
        "w2a": w2a, "b2a": b2a, "w2b": w2b, "b2b": b2b,
    }


def critic_sf_reference(obs, action, task, params, quantize_like_kernel=False):
    """Pure-JAX reference. If quantize_like_kernel, apply the same bf16 rounding as the
    kernel (matmul inputs/weights/activations) so the comparison isolates kernel bugs."""
    f32 = jnp.float32

    def q_(x):
        return x.astype(jnp.bfloat16).astype(f32) if quantize_like_kernel else x.astype(f32)

    obs = q_(obs)
    action = q_(action)
    task = q_(task)
    x = jnp.concatenate([obs, action], axis=-1)
    h = x @ q_(params["wt"]) + params["bt"]
    mu = jnp.mean(h, axis=-1, keepdims=True)
    var = jnp.mean((h - mu) ** 2, axis=-1, keepdims=True)
    h = (h - mu) / jnp.sqrt(var + LN_EPS)
    h = q_(jnp.tanh(h * params["ln_g"] + params["ln_b"]))

    def q_head(wa, ba, wb, bb):
        z = q_(jnp.maximum(h @ q_(wa) + ba, 0.0))
        return z @ q_(wb) + bb

    q1 = q_head(params["w1a"], params["b1a"], params["w1b"], params["b1b"])
    q2 = q_head(params["w2a"], params["b2a"], params["w2b"], params["b2b"])
    q1 = jnp.sum(task * q1, axis=-1, keepdims=True)
    q2 = jnp.sum(task * q2, axis=-1, keepdims=True)
    return q1, q2


if __name__ == "__main__":
    # Small shapes consistent with the module's state-based branch.
    B, obs_dim, action_dim, hidden_dim, sf_dim = 8, 24, 6, 32, 16
    # feature_dim is only used in the 'pixels' branch.
    # TODO(synk): 'pixels' obs_type branch (trunk(obs) -> concat(action)) not implemented;
    # this kernel covers the state-based forward.

    key = jax.random.PRNGKey(0)
    k_obs, k_act, k_task, k_par = jax.random.split(key, 4)
    obs = jax.random.normal(k_obs, (B, obs_dim), jnp.float32)
    action = jax.random.normal(k_act, (B, action_dim), jnp.float32)
    task = jax.random.normal(k_task, (B, sf_dim), jnp.float32)
    params = init_params(k_par, obs_dim, action_dim, hidden_dim, sf_dim)
    packed = pack_params(params, obs_dim, action_dim, hidden_dim, sf_dim)

    q1, q2 = critic_sf_forward(obs, action, task, packed, hidden_dim)
    q1 = jax.block_until_ready(q1)
    q2 = jax.block_until_ready(q2)
    assert q1.shape == (B, 1) and q2.shape == (B, 1)

    # strict check vs a reference with the same bf16 rounding (isolates kernel bugs)
    r1q, r2q = critic_sf_reference(obs, action, task, params, quantize_like_kernel=True)
    assert jnp.allclose(q1, r1q, atol=2e-2, rtol=2e-2)
    assert jnp.allclose(q2, r2q, atol=2e-2, rtol=2e-2)

    # loose check vs pure-f32 module semantics (bf16 streams => wider tolerance)
    r1, r2 = critic_sf_reference(obs, action, task, params)
    assert jnp.allclose(q1, r1, atol=1e-1, rtol=1e-1)
    assert jnp.allclose(q2, r2, atol=1e-1, rtol=1e-1)

    print("KERNEL_OK")
</pallas_src>

<mosaic_0001>
module attributes {stable_mosaic.version = 11 : i64} {
  func.func @kernel(%arg0: i32, %arg1: memref<16x24xbf16, #tpu.memory_space<vmem>>, %arg2: memref<16x6xbf16, #tpu.memory_space<vmem>>, %arg3: memref<16x128xbf16, #tpu.memory_space<vmem>>, %arg4: memref<24x128xbf16, #tpu.memory_space<vmem>>, %arg5: memref<6x128xbf16, #tpu.memory_space<vmem>>, %arg6: memref<1x128xf32, #tpu.memory_space<vmem>>, %arg7: memref<1x128xf32, #tpu.memory_space<vmem>>, %arg8: memref<1x128xf32, #tpu.memory_space<vmem>>, %arg9: memref<128x256xbf16, #tpu.memory_space<vmem>>, %arg10: memref<1x256xf32, #tpu.memory_space<vmem>>, %arg11: memref<128x128xbf16, #tpu.memory_space<vmem>>, %arg12: memref<1x128xf32, #tpu.memory_space<vmem>>, %arg13: memref<128x128xbf16, #tpu.memory_space<vmem>>, %arg14: memref<1x128xf32, #tpu.memory_space<vmem>>, %arg15: memref<16x2xf32, #tpu.memory_space<vmem>>) attributes {dimension_semantics = [#tpu.dimension_semantics<parallel>], iteration_bounds = array<i64: 1>, scalar_prefetch = 0 : i64, scratch_operands = 0 : i64, tpu.core_type = #tpu.core_type<tc>, window_params = [{transform_indices = @transform_0, window_bounds = array<i64: 16, 24>}, {transform_indices = @transform_1, window_bounds = array<i64: 16, 6>}, {transform_indices = @transform_2, window_bounds = array<i64: 16, 128>}, {pipeline_mode = #tpu.pipeline_mode<synchronous>, transform_indices = @transform_3, window_bounds = array<i64: 24, 128>}, {pipeline_mode = #tpu.pipeline_mode<synchronous>, transform_indices = @transform_4, window_bounds = array<i64: 6, 128>}, {pipeline_mode = #tpu.pipeline_mode<synchronous>, transform_indices = @transform_5, window_bounds = array<i64: 1, 128>}, {pipeline_mode = #tpu.pipeline_mode<synchronous>, transform_indices = @transform_6, window_bounds = array<i64: 1, 128>}, {pipeline_mode = #tpu.pipeline_mode<synchronous>, transform_indices = @transform_7, window_bounds = array<i64: 1, 128>}, {pipeline_mode = #tpu.pipeline_mode<synchronous>, transform_indices = @transform_8, window_bounds = array<i64: 128, 256>}, {pipeline_mode = #tpu.pipeline_mode<synchronous>, transform_indices = @transform_9, window_bounds = array<i64: 1, 256>}, {pipeline_mode = #tpu.pipeline_mode<synchronous>, transform_indices = @transform_10, window_bounds = array<i64: 128, 128>}, {pipeline_mode = #tpu.pipeline_mode<synchronous>, transform_indices = @transform_11, window_bounds = array<i64: 1, 128>}, {pipeline_mode = #tpu.pipeline_mode<synchronous>, transform_indices = @transform_12, window_bounds = array<i64: 128, 128>}, {pipeline_mode = #tpu.pipeline_mode<synchronous>, transform_indices = @transform_13, window_bounds = array<i64: 1, 128>}, {transform_indices = @transform_14, window_bounds = array<i64: 16, 2>}]} {
    %c0 = arith.constant 0 : index
    %c0_0 = arith.constant 0 : index
    %0 = vector.load %arg1[%c0, %c0_0] : memref<16x24xbf16, #tpu.memory_space<vmem>>, vector<16x24xbf16>
    %c0_1 = arith.constant 0 : index
    %c0_2 = arith.constant 0 : index
    %1 = vector.load %arg4[%c0_1, %c0_2] : memref<24x128xbf16, #tpu.memory_space<vmem>>, vector<24x128xbf16>
    %cst = arith.constant dense<0.000000e+00> : vector<16x128xf32>
    %2 = tpu.matmul %0, %1, %cst {dimension_numbers = #tpu.dot_dimension_numbers<[1], [0], [0], [1], [0, 0, 1, 1], [], []>} : vector<16x24xbf16>, vector<24x128xbf16>, vector<16x128xf32> -> vector<16x128xf32>
    %c0_3 = arith.constant 0 : index
    %c0_4 = arith.constant 0 : index
    %3 = vector.load %arg2[%c0_3, %c0_4] : memref<16x6xbf16, #tpu.memory_space<vmem>>, vector<16x6xbf16>
    %c0_5 = arith.constant 0 : index
    %c0_6 = arith.constant 0 : index
    %4 = vector.load %arg5[%c0_5, %c0_6] : memref<6x128xbf16, #tpu.memory_space<vmem>>, vector<6x128xbf16>
    %cst_7 = arith.constant dense<0.000000e+00> : vector<16x128xf32>
    %5 = tpu.matmul %3, %4, %cst_7 {dimension_numbers = #tpu.dot_dimension_numbers<[1], [0], [0], [1], [0, 0, 1, 1], [], []>} : vector<16x6xbf16>, vector<6x128xbf16>, vector<16x128xf32> -> vector<16x128xf32>
    %6 = arith.addf %2, %5 : vector<16x128xf32>
    %c0_8 = arith.constant 0 : index
    %c0_9 = arith.constant 0 : index
    %7 = vector.load %arg6[%c0_8, %c0_9] : memref<1x128xf32, #tpu.memory_space<vmem>>, vector<1x128xf32>
    %8 = vector.broadcast %7 : vector<1x128xf32> to vector<16x128xf32>
    %9 = arith.addf %6, %8 : vector<16x128xf32>
    %cst_10 = arith.constant dense<0.000000e+00> : vector<16xf32>
    %10 = vector.multi_reduction <add>, %9, %cst_10 [1] : vector<16x128xf32> to vector<16xf32>
    %11 = vector.shape_cast %10 : vector<16xf32> to vector<16x1xf32>
    %12 = arith.mulf %9, %9 : vector<16x128xf32>
    %cst_11 = arith.constant dense<0.000000e+00> : vector<16xf32>
    %13 = vector.multi_reduction <add>, %12, %cst_11 [1] : vector<16x128xf32> to vector<16xf32>
    %14 = vector.shape_cast %13 : vector<16xf32> to vector<16x1xf32>
    %cst_12 = arith.constant 3.125000e-02 : f32
    %15 = vector.broadcast %cst_12 : f32 to vector<16x1xf32>
    %16 = arith.mulf %11, %15 : vector<16x1xf32>
    %cst_13 = arith.constant 3.125000e-02 : f32
    %17 = vector.broadcast %cst_13 : f32 to vector<16x1xf32>
    %18 = arith.mulf %14, %17 : vector<16x1xf32>
    %19 = arith.mulf %16, %16 : vector<16x1xf32>
    %20 = arith.subf %18, %19 : vector<16x1xf32>
    %cst_14 = arith.constant 0.000000e+00 : f32
    %21 = vector.broadcast %cst_14 : f32 to vector<16x1xf32>
    %22 = arith.maximumf %20, %21 : vector<16x1xf32>
    %23 = vector.broadcast %16 : vector<16x1xf32> to vector<16x128xf32>
    %24 = arith.subf %9, %23 : vector<16x128xf32>
    %cst_15 = arith.constant 9.99999974E-6 : f32
    %25 = vector.broadcast %cst_15 : f32 to vector<16x1xf32>
    %26 = arith.addf %22, %25 : vector<16x1xf32>
    %27 = math.rsqrt %26 : vector<16x1xf32>
    %28 = vector.broadcast %27 : vector<16x1xf32> to vector<16x128xf32>
    %29 = arith.mulf %24, %28 : vector<16x128xf32>
    %c0_16 = arith.constant 0 : index
    %c0_17 = arith.constant 0 : index
    %30 = vector.load %arg7[%c0_16, %c0_17] : memref<1x128xf32, #tpu.memory_space<vmem>>, vector<1x128xf32>
    %31 = vector.broadcast %30 : vector<1x128xf32> to vector<16x128xf32>
    %32 = arith.mulf %29, %31 : vector<16x128xf32>
    %c0_18 = arith.constant 0 : index
    %c0_19 = arith.constant 0 : index
    %33 = vector.load %arg8[%c0_18, %c0_19] : memref<1x128xf32, #tpu.memory_space<vmem>>, vector<1x128xf32>
    %34 = vector.broadcast %33 : vector<1x128xf32> to vector<16x128xf32>
    %35 = arith.addf %32, %34 : vector<16x128xf32>
    %36 = math.tanh %35 : vector<16x128xf32>
    %37 = arith.truncf %36 : vector<16x128xf32> to vector<16x128xbf16>
    %c0_20 = arith.constant 0 : index
    %c0_21 = arith.constant 0 : index
    %38 = vector.load %arg9[%c0_20, %c0_21] : memref<128x256xbf16, #tpu.memory_space<vmem>>, vector<128x256xbf16>
    %cst_22 = arith.constant dense<0.000000e+00> : vector<16x256xf32>
    %39 = tpu.matmul %37, %38, %cst_22 {dimension_numbers = #tpu.dot_dimension_numbers<[1], [0], [0], [1], [0, 0, 1, 1], [], []>} : vector<16x128xbf16>, vector<128x256xbf16>, vector<16x256xf32> -> vector<16x256xf32>
    %c0_23 = arith.constant 0 : index
    %c0_24 = arith.constant 0 : index
    %40 = vector.load %arg10[%c0_23, %c0_24] : memref<1x256xf32, #tpu.memory_space<vmem>>, vector<1x256xf32>
    %41 = vector.broadcast %40 : vector<1x256xf32> to vector<16x256xf32>
    %42 = arith.addf %39, %41 : vector<16x256xf32>
    %cst_25 = arith.constant 0.000000e+00 : f32
    %43 = vector.broadcast %cst_25 : f32 to vector<16x256xf32>
    %44 = arith.maximumf %42, %43 : vector<16x256xf32>
    %45 = arith.truncf %44 : vector<16x256xf32> to vector<16x256xbf16>
    %46 = vector.extract_strided_slice %45 {offsets = [0, 0], sizes = [16, 128], strides = [1, 1]} : vector<16x256xbf16> to vector<16x128xbf16>
    %47 = vector.extract_strided_slice %45 {offsets = [0, 128], sizes = [16, 128], strides = [1, 1]} : vector<16x256xbf16> to vector<16x128xbf16>
    %c0_26 = arith.constant 0 : index
    %c0_27 = arith.constant 0 : index
    %48 = vector.load %arg11[%c0_26, %c0_27] : memref<128x128xbf16, #tpu.memory_space<vmem>>, vector<128x128xbf16>
    %cst_28 = arith.constant dense<0.000000e+00> : vector<16x128xf32>
    %49 = tpu.matmul %46, %48, %cst_28 {dimension_numbers = #tpu.dot_dimension_numbers<[1], [0], [0], [1], [0, 0, 1, 1], [], []>} : vector<16x128xbf16>, vector<128x128xbf16>, vector<16x128xf32> -> vector<16x128xf32>
    %c0_29 = arith.constant 0 : index
    %c0_30 = arith.constant 0 : index
    %50 = vector.load %arg12[%c0_29, %c0_30] : memref<1x128xf32, #tpu.memory_space<vmem>>, vector<1x128xf32>
    %51 = vector.broadcast %50 : vector<1x128xf32> to vector<16x128xf32>
    %52 = arith.addf %49, %51 : vector<16x128xf32>
    %c0_31 = arith.constant 0 : index
    %c0_32 = arith.constant 0 : index
    %53 = vector.load %arg13[%c0_31, %c0_32] : memref<128x128xbf16, #tpu.memory_space<vmem>>, vector<128x128xbf16>
    %cst_33 = arith.constant dense<0.000000e+00> : vector<16x128xf32>
    %54 = tpu.matmul %47, %53, %cst_33 {dimension_numbers = #tpu.dot_dimension_numbers<[1], [0], [0], [1], [0, 0, 1, 1], [], []>} : vector<16x128xbf16>, vector<128x128xbf16>, vector<16x128xf32> -> vector<16x128xf32>
    %c0_34 = arith.constant 0 : index
    %c0_35 = arith.constant 0 : index
    %55 = vector.load %arg14[%c0_34, %c0_35] : memref<1x128xf32, #tpu.memory_space<vmem>>, vector<1x128xf32>
    %56 = vector.broadcast %55 : vector<1x128xf32> to vector<16x128xf32>
    %57 = arith.addf %54, %56 : vector<16x128xf32>
    %c0_36 = arith.constant 0 : index
    %c0_37 = arith.constant 0 : index
    %58 = vector.load %arg3[%c0_36, %c0_37] : memref<16x128xbf16, #tpu.memory_space<vmem>>, vector<16x128xbf16>
    %59 = arith.extf %58 : vector<16x128xbf16> to vector<16x128xf32>
    %60 = arith.mulf %59, %52 : vector<16x128xf32>
    %cst_38 = arith.constant dense<0.000000e+00> : vector<16xf32>
    %61 = vector.multi_reduction <add>, %60, %cst_38 [1] : vector<16x128xf32> to vector<16xf32>
    %62 = vector.shape_cast %61 : vector<16xf32> to vector<16x1xf32>
    %63 = arith.mulf %59, %57 : vector<16x128xf32>
    %cst_39 = arith.constant dense<0.000000e+00> : vector<16xf32>
    %64 = vector.multi_reduction <add>, %63, %cst_39 [1] : vector<16x128xf32> to vector<16xf32>
    %65 = vector.shape_cast %64 : vector<16xf32> to vector<16x1xf32>
    %66 = tpu.concatenate %62, %65 in 1 : vector<16x1xf32>, vector<16x1xf32> -> vector<16x2xf32>
    %c0_40 = arith.constant 0 : index
    %c0_41 = arith.constant 0 : index
    %67 = vector.load %arg15[%c0_40, %c0_41] : memref<16x2xf32, #tpu.memory_space<vmem>>, vector<16x2xf32>
    tpu.vector_store %arg15[%c0_40, %c0_41], %66 {strides = array<i32>} : memref<16x2xf32, #tpu.memory_space<vmem>>, vector<16x2xf32>,
    return
  }
  func.func @transform_0(%arg0: i32) -> (i32, i32) {
    %c0_i32 = arith.constant 0 : i32
    %c0_i32_0 = arith.constant 0 : i32
    return %arg0, %c0_i32 : i32, i32
  }
  func.func @transform_1(%arg0: i32) -> (i32, i32) {
    %c0_i32 = arith.constant 0 : i32
    %c0_i32_0 = arith.constant 0 : i32
    return %arg0, %c0_i32 : i32, i32
  }
  func.func @transform_2(%arg0: i32) -> (i32, i32) {
    %c0_i32 = arith.constant 0 : i32
    %c0_i32_0 = arith.constant 0 : i32
    return %arg0, %c0_i32 : i32, i32
  }
  func.func @transform_3(%arg0: i32) -> (i32, i32) {
    %c0_i32 = arith.constant 0 : i32
    %c0_i32_0 = arith.constant 0 : i32
    %c0_i32_1 = arith.constant 0 : i32
    return %c0_i32, %c0_i32_0 : i32, i32
  }
  func.func @transform_4(%arg0: i32) -> (i32, i32) {
    %c0_i32 = arith.constant 0 : i32
    %c0_i32_0 = arith.constant 0 : i32
    %c0_i32_1 = arith.constant 0 : i32
    return %c0_i32, %c0_i32_0 : i32, i32
  }
  func.func @transform_5(%arg0: i32) -> (i32, i32) {
    %c0_i32 = arith.constant 0 : i32
    %c0_i32_0 = arith.constant 0 : i32
    %c0_i32_1 = arith.constant 0 : i32
    return %c0_i32, %c0_i32_0 : i32, i32
  }
  func.func @transform_6(%arg0: i32) -> (i32, i32) {
    %c0_i32 = arith.constant 0 : i32
    %c0_i32_0 = arith.constant 0 : i32
    %c0_i32_1 = arith.constant 0 : i32
    return %c0_i32, %c0_i32_0 : i32, i32
  }
  func.func @transform_7(%arg0: i32) -> (i32, i32) {
    %c0_i32 = arith.constant 0 : i32
    %c0_i32_0 = arith.constant 0 : i32
    %c0_i32_1 = arith.constant 0 : i32
    return %c0_i32, %c0_i32_0 : i32, i32
  }
  func.func @transform_8(%arg0: i32) -> (i32, i32) {
    %c0_i32 = arith.constant 0 : i32
    %c0_i32_0 = arith.constant 0 : i32
    %c0_i32_1 = arith.constant 0 : i32
    return %c0_i32, %c0_i32_0 : i32, i32
  }
  func.func @transform_9(%arg0: i32) -> (i32, i32) {
    %c0_i32 = arith.constant 0 : i32
    %c0_i32_0 = arith.constant 0 : i32
    %c0_i32_1 = arith.constant 0 : i32
    return %c0_i32, %c0_i32_0 : i32, i32
  }
  func.func @transform_10(%arg0: i32) -> (i32, i32) {
    %c0_i32 = arith.constant 0 : i32
    %c0_i32_0 = arith.constant 0 : i32
    %c0_i32_1 = arith.constant 0 : i32
    return %c0_i32, %c0_i32_0 : i32, i32
  }
  func.func @transform_11(%arg0: i32) -> (i32, i32) {
    %c0_i32 = arith.constant 0 : i32
    %c0_i32_0 = arith.constant 0 : i32
    %c0_i32_1 = arith.constant 0 : i32
    return %c0_i32, %c0_i32_0 : i32, i32
  }
  func.func @transform_12(%arg0: i32) -> (i32, i32) {
    %c0_i32 = arith.constant 0 : i32
    %c0_i32_0 = arith.constant 0 : i32
    %c0_i32_1 = arith.constant 0 : i32
    return %c0_i32, %c0_i32_0 : i32, i32
  }
  func.func @transform_13(%arg0: i32) -> (i32, i32) {
    %c0_i32 = arith.constant 0 : i32
    %c0_i32_0 = arith.constant 0 : i32
    %c0_i32_1 = arith.constant 0 : i32
    return %c0_i32, %c0_i32_0 : i32, i32
  }
  func.func @transform_14(%arg0: i32) -> (i32, i32) {
    %c0_i32 = arith.constant 0 : i32
    %c0_i32_0 = arith.constant 0 : i32
    return %arg0, %c0_i32 : i32, i32
  }
}

</mosaic_0001>

<bundles_post_ra>
// kernel: tpu_custom_call.1
= control target key start
LH: loop header
LB: loop body
LE: loop exit
PB: predicated region body
PF: predicated region fallthrough
CT: control target
= control target key end

     0   :  { %19 = vsyncpa [#allocation3], 0  ;;  %s1205_s0 = inlined_call_operand.vmem [shape: bf16[16,24], index: 0, kind: input, shape index: {}]   ;;  %s1206_s1 = inlined_call_operand.vmem [shape: bf16[16,6], index: 1, kind: input, shape index: {}]   ;;  %s1207_s2 = inlined_call_operand.hbm [shape: bf16[16,128], index: 2, kind: input, shape index: {}]   ;;  %s1208_s3 = inlined_call_operand.vmem [shape: bf16[24,128], index: 3, kind: input, shape index: {}]   ;;  %s1209_s4 = inlined_call_operand.vmem [shape: bf16[6,128], index: 4, kind: input, shape index: {}]   ;;  %s1210_s5 = inlined_call_operand.vmem [shape: f32[1,128], index: 5, kind: input, shape index: {}]   ;;  %s1211_s6 = inlined_call_operand.vmem [shape: f32[1,128], index: 6, kind: input, shape index: {}]   ;;  %s1212_s7 = inlined_call_operand.vmem [shape: f32[1,128], index: 7, kind: input, shape index: {}]   ;;  %s1213_s8 = inlined_call_operand.hbm [shape: bf16[128,256], index: 8, kind: input, shape index: {}]   ;;  %s1214_s9 = inlined_call_operand.vmem [shape: f32[1,256], index: 9, kind: input, shape index: {}]   ;;  %s1215_s10 = inlined_call_operand.hbm [shape: bf16[128,128], index: 10, kind: input, shape index: {}]   ;;  %s1216_s11 = inlined_call_operand.vmem [shape: f32[1,128], index: 11, kind: input, shape index: {}]   ;;  %s1217_s12 = inlined_call_operand.hbm [shape: bf16[128,128], index: 12, kind: input, shape index: {}]   ;;  %s1218_s13 = inlined_call_operand.vmem [shape: f32[1,128], index: 13, kind: input, shape index: {}]   ;;  %s1219_s14 = inlined_call_operand.vmem [shape: f32[16,2], index: 14, kind: output, shape index: {}]  }
   0x1   :  { %20 = vsyncpa [#allocation5], 0 }
   0x2   :  { %21 = vsyncpa [#allocation8], 0  ;;  %s977_s29 = smov [#allocation4]   ;;  %s883_s17 = scalar_lea.hbm %s1213_s8, 2048 }
   0x3   :  { %s53_s30 = sshll.u32 %s977_s29, 4  ;;  %p884_p0 = scmp.ne.s32.totalorder %s1213_s8, %s883_s17  ;;  %s54_s30 = int_to_ptr.vmem [resolvable:$true] %s53_s30 }
   0x4   :  { %p887_p1 = scmp.lt.u32.totalorder %s883_s17, %s1213_s8 }
   0x6   :  { %p889_p2 = pnand %p887_p1, %p884_p0 }
   0x8   :  { %892 = shalt.err (!%p889_p2)
}
   0x9   :  { %s893_s22 = scalar_lea.vmem %s54_s30, 2048  ;;  %p898_p4 = scmp.lt.s32.totalorder %s54_s30, %s54_s30 }
   0xa   :  { %p894_p3 = scmp.ne.s32.totalorder %s54_s30, %s893_s22  ;;  %p899_p5 = scmp.lt.s32.totalorder %s893_s22, %s893_s22 }
   0xc   :  { %p900_p6 = por %p899_p5, %p898_p4 }
   0xe   :  { %p901_p7 = pnand %p900_p6, %p894_p3 }
  0x10   :  { %904 = shalt.err (!%p901_p7)
}
  0x11   :  { %s978_s23 = smov 128   ;;  %s979_s24 = smov 8  }
  0x12   :  { %59 = dma.hbm_to_vmem [thread:$0]  %s1213_s8, 2048, %s54_s30, [#allocation5], %s978_s23, %s978_s23, %s979_s24  }
  0x13   :  { %s980_s27 = smov [#allocation2]   ;;  %s905_s16 = scalar_lea.hbm %s1207_s2, 128 }
  0x14   :  { %s31_s28 = sshll.u32 %s980_s27, 4  ;;  %p906_p8 = scmp.ne.s32.totalorder %s1207_s2, %s905_s16  ;;  %s32_s28 = int_to_ptr.vmem [resolvable:$true] %s31_s28 }
  0x15   :  { %p909_p9 = scmp.lt.u32.totalorder %s905_s16, %s1207_s2 }
  0x17   :  { %p911_p10 = pnand %p909_p9, %p906_p8 }
  0x19   :  { %914 = shalt.err (!%p911_p10)
}
  0x1a   :  { %s915_s21 = scalar_lea.vmem %s32_s28, 128  ;;  %p920_p12 = scmp.lt.s32.totalorder %s32_s28, %s32_s28 }
  0x1b   :  { %p916_p11 = scmp.ne.s32.totalorder %s32_s28, %s915_s21  ;;  %p921_p13 = scmp.lt.s32.totalorder %s915_s21, %s915_s21 }
  0x1d   :  { %p922_p0 = por %p921_p13, %p920_p12 }
  0x1f   :  { %p923_p1 = pnand %p922_p0, %p916_p11 }
  0x21   :  { %926 = shalt.err (!%p923_p1)
}
  0x22   :  { %s981_s8 = smov 64   ;;  %s982_s30 = smov 4  }
  0x23   :  { %37 = dma.hbm_to_vmem [thread:$0]  %s1207_s2, 128, %s32_s28, [#allocation3], %s981_s8, %s981_s8, %s982_s30  }
  0x24   :  { %s983_s24 = smov [#allocation6]   ;;  %s984_s26 = smov [#allocation7]  }
  0x25   :  { %s67_s25 = sshll.u32 %s983_s24, 4  ;;  %s81_s27 = sshll.u32 %s984_s26, 4  ;;  %s68_s25 = int_to_ptr.vmem [resolvable:$true] %s67_s25  ;;  %s1090_s27 = int_to_ptr.vmem [resolvable:$true] %s81_s27 }
  0x26   :  { %s927_s16 = scalar_lea.hbm %s1215_s10, 1024 }
  0x27   :  { %p928_p2 = scmp.ne.s32.totalorder %s1215_s10, %s927_s16  ;;  %p931_p3 = scmp.lt.u32.totalorder %s927_s16, %s1215_s10 }
  0x29   :  { %p933_p4 = pnand %p931_p3, %p928_p2 }
  0x2b   :  { %936 = shalt.err (!%p933_p4)
}
  0x2c   :  { %s937_s2 = scalar_lea.vmem %s68_s25, 1024  ;;  %p942_p6 = scmp.lt.s32.totalorder %s68_s25, %s68_s25 }
  0x2d   :  { %p938_p5 = scmp.ne.s32.totalorder %s68_s25, %s937_s2  ;;  %p943_p7 = scmp.lt.s32.totalorder %s937_s2, %s937_s2 }
  0x2f   :  { %p944_p8 = por %p943_p7, %p942_p6 }
  0x31   :  { %p945_p9 = pnand %p944_p8, %p938_p5 }
  0x33   :  { %948 = shalt.err (!%p945_p9)
}
  0x34   :  { %73 = dma.hbm_to_vmem [thread:$0]  %s1215_s10, 1024, %s68_s25, [#allocation5], %s981_s8, %s981_s8, %s982_s30  }
  0x35   :  { %s949_s24 = scalar_lea.hbm %s1217_s12, 1024 }
  0x36   :  { %p950_p10 = scmp.ne.s32.totalorder %s1217_s12, %s949_s24  ;;  %p953_p11 = scmp.lt.u32.totalorder %s949_s24, %s1217_s12 }
  0x38   :  { %p955_p12 = pnand %p953_p11, %p950_p10 }
  0x3a   :  { %958 = shalt.err (!%p955_p12)
}
  0x3b   :  { %s959_s17 = scalar_lea.vmem %s1090_s27, 1024  ;;  %p964_p0 = scmp.lt.s32.totalorder %s1090_s27, %s1090_s27 }
  0x3c   :  { %p960_p13 = scmp.ne.s32.totalorder %s1090_s27, %s959_s17  ;;  %p965_p1 = scmp.lt.s32.totalorder %s959_s17, %s959_s17 }
  0x3e   :  { %p966_p2 = por %p965_p1, %p964_p0 }
  0x40   :  { %p967_p3 = pnand %p966_p2, %p960_p13 }
  0x42   :  { %970 = shalt.err (!%p967_p3)
}
  0x43   :  { %87 = dma.hbm_to_vmem [thread:$0]  %s1217_s12, 1024, %s1090_s27, [#allocation8], %s981_s8, %s981_s8, %s982_s30  }
  0x44   :  { %971 = dma.done.wait [#allocation3], 128  }
  0x45   :  { %972 = vsyncadd [#allocation3], 4294967168 }
  0x46   :  { %973 = dma.done.wait [#allocation5], 3072  }
  0x47   :  { %974 = vsyncadd [#allocation5], 4294964224 }
  0x48   :  { %975 = dma.done.wait [#allocation8], 1024  }
  0x49   :  { %976 = vsyncadd [#allocation8], 4294966272  ;;  %v985_v0 = vmov 0.0   ;;  %vm986_vm0 = vmmov 0   ;;  %vm120_vm1 = vcmask 1042432   ;;  %v831_v3 = vld [vmem:[%s1206_s1] sm:$0xff]  }
  0x4a   :  { %766 = vmatprep.subr.bf16.mxu1 %v985_v0  ;;  %768 = vmatprep.mubr.msk.bf16.mxu1 %vm986_vm0, %v985_v0  ;;  %v110_v1 = vld [vmem:[%s1209_s4] sm:$0x7]  ;;  %vm116_vm2 = vcmask 48128   ;;  %v833_v5 = vld [vmem:[%s1208_s3 + $0x8] ss:$0 sps:$4 sm:$0xff]   ;;  %vm183_vm3 = vcmask 1043456  }
  0x4b   :  { %v122_v2 = vsel %vm120_vm1, %v110_v1, 0  ;;  %v832_v4 = vld [vmem:[%s1208_s3] sm:$0xff]   ;;  %v185_v6 = vsel %vm183_vm3, %v833_v5, 0  ;;  %vm179_vm4 = vcmask 195584   ;;  %v835_v23 = vld [vmem:[#allocation4 + $0x4] ss:$8 sps:$4 sm:$0xff]  }
  0x4c   :  { %767 = vmatpush3.bf16.msra.mxu1 %v122_v2  ;;  %v834_v7 = vld [vmem:[%s1205_s0] sm:$0xff]   ;;  %v837_v24 = vld [vmem:[#allocation4] ss:$8 sps:$4 sm:$0xff]   ;;  %394 = vmatprep.subr.bf16.mxu0 %v835_v23  ;;  %v841_v27 = vld [vmem:[#allocation4 + $0x24] ss:$8 sps:$4 sm:$0xff]   ;;  %v987_v36 = vmov 0  }
  0x4d   :  { %772 = vmatprep.subr.bf16.mxu1 %v985_v0  ;;  %v702_v13 = vld [vmem:[%s1210_s5] ss:$0 sm:$0xff]  ;;  %395 = vmatpush1.bf16.msra.mxu0 %v837_v24  ;;  %v838_v25 = vld [vmem:[#allocation4 + $0x14] ss:$8 sps:$4 sm:$0xff]   ;;  %v843_v28 = vld [vmem:[#allocation4 + $0x20] ss:$8 sps:$4 sm:$0xff]   ;;  %v304_v24 = vlaneseq }
  0x4e   :  { %v840_v26 = vld [vmem:[#allocation4 + $0x10] ss:$8 sps:$4 sm:$0xff]   ;;  %396 = vmatprep.subr.bf16.mxu0 %v838_v25  ;;  %v844_v29 = vld [vmem:[#allocation4 + $0x34] ss:$8 sps:$4 sm:$0xff]   ;;  %v847_v31 = vld [vmem:[#allocation4 + $0x44] ss:$8 sps:$4 sm:$0xff]   ;;  %426 = vmatprep.mubr.bf16.mxu0 %v987_v36 }
  0x4f   :  { %769 = vmatmul.mubr.msk.bf16.vlgmr.msra.gmra.mrb[0].mxu1 %vm116_vm2, %v831_v3  ;;  %v846_v30 = vld [vmem:[#allocation4 + $0x30] ss:$8 sps:$4 sm:$0xff]   ;;  %v849_v32 = vld [vmem:[#allocation4 + $0x40] ss:$8 sps:$4 sm:$0xff]   ;;  %v850_v33 = vld [vmem:[#allocation4 + $0x54] ss:$8 sps:$4 sm:$0xff]  }
  0x50   :  { %773 = vmatpush3.bf16.msra.mxu1 %v832_v4  ;;  %776 = vmatprep.mubr.msk.bf16.mxu1 %vm986_vm0, %v985_v0  ;;  %v852_v34 = vld [vmem:[#allocation4 + $0x50] ss:$8 sps:$4 sm:$0xff]   ;;  %v853_v35 = vld [vmem:[#allocation4 + $0x64] ss:$8 sps:$4 sm:$0xff]   ;;  %v855_v37 = vld [vmem:[#allocation4 + $0x60] ss:$8 sps:$4 sm:$0xff]  }
  0x51   :  { %774 = vmatprep.subr.bf16.mxu1 %v985_v0  ;;  %397 = vmatpush1.bf16.msra.mxu0 %v840_v26  ;;  %v856_v38 = vld [vmem:[#allocation4 + $0x74] ss:$8 sps:$4 sm:$0xff]   ;;  %v858_v39 = vld [vmem:[#allocation4 + $0x70] ss:$8 sps:$4 sm:$0xff]   ;;  %v859_v40 = vld [vmem:[#allocation6] sm:$0xff]   ;;  %v305_v25 = vshrl.u32 %v304_v24, 7 }
  0x52   :  { %398 = vmatprep.subr.bf16.mxu0 %v841_v27  ;;  %v861_v41 = vld [vmem:[#allocation6 + $0x8] sm:$0xff]   ;;  %v863_v42 = vld [vmem:[#allocation6 + $0x10] sm:$0xff]   ;;  %v865_v43 = vld [vmem:[#allocation6 + $0x18] sm:$0xff]   ;;  %vm683_vm5 = vcmask 7168   ;;  %vm686_vm6 = vcmask 15360  }
  0x53   :  { %v867_v44 = vld [vmem:[#allocation6 + $0x20] sm:$0xff]   ;;  %v869_v45 = vld [vmem:[#allocation6 + $0x28] sm:$0xff]   ;;  %v703_v1 = vld [vmem:[%s1211_s6] ss:$0 sm:$0xff]  ;;  %v306_v26 = vsub.s32 0, %v305_v25 }
  0x54   :  { %775 = vmatpush3.bf16.msra.mxu1 %v185_v6  ;;  %v704_v5 = vld [vmem:[%s1212_s7] ss:$0 sm:$0xff] }
  0x55   :  { %780 = vmatprep.subr.bf16.mxu1 %v985_v0  ;;  %399 = vmatpush1.bf16.msra.mxu0 %v843_v28  ;;  %v874_v23 = vld [vmem:[#allocation7 + $0x38] sm:$0xff]   ;;  %v310_v28 = vsub.s32 1, %v305_v25 }
  0x56   :  { %400 = vmatprep.subr.bf16.mxu0 %v844_v29  ;;  %v302_v27 = vld [vmem:[%s1214_s9] sm:$0x3] }
  0x57   :  { %777 = vmatmul.mubr.msk.bf16.vlgmr.msra.gmra.mrb[4].mxu1 %vm179_vm4, %v834_v7  ;;  %v307_v29 = vrot.slane %v302_v27, %v306_v26 }
  0x58   :  { %796 = vmatprep.mubr.msk.bf16.mxu1 %vm986_vm0, %v985_v0  ;;  %781 = vmatpush3.bf16.msra.mxu1 %v859_v40 }
  0x59   :  { %401 = vmatpush1.bf16.msra.mxu0 %v846_v30  ;;  %782 = vmatprep.subr.bf16.mxu1 %v985_v0  ;;  %v311_v30 = vrot.slane %v302_v27, %v310_v28 }
  0x5a   :  { %402 = vmatprep.subr.bf16.mxu0 %v847_v31 }
  0x5c   :  { %783 = vmatpush3.bf16.msra.mxu1 %v861_v41 }
  0x5d   :  { %403 = vmatpush1.bf16.msra.mxu0 %v849_v32  ;;  %784 = vmatprep.subr.bf16.mxu1 %v985_v0 }
  0x5e   :  { %404 = vmatprep.subr.bf16.mxu0 %v850_v33 }
  0x60   :  { %785 = vmatpush3.bf16.msra.mxu1 %v863_v42 }
  0x61   :  { %405 = vmatpush1.bf16.msra.mxu0 %v852_v34  ;;  %786 = vmatprep.subr.bf16.mxu1 %v985_v0 }
  0x62   :  { %406 = vmatprep.subr.bf16.mxu0 %v853_v35 }
  0x64   :  { %787 = vmatpush3.bf16.msra.mxu1 %v865_v43 }
  0x65   :  { %407 = vmatpush1.bf16.msra.mxu0 %v855_v37  ;;  %788 = vmatprep.subr.bf16.mxu1 %v985_v0 }
  0x66   :  { %408 = vmatprep.subr.bf16.mxu0 %v856_v38 }
  0x68   :  { %789 = vmatpush3.bf16.msra.mxu1 %v867_v44  ;;  %v740_v44 = vld [vmem:[#allocation2] sm:$0xff]  }
  0x69   :  { %409 = vmatpush1.bf16.msra.mxu0 %v858_v39  ;;  %790 = vmatprep.subr.bf16.mxu1 %v985_v0 }
  0x6a   :  { %800 = vmatprep.subr.bf16.mxu0 %v985_v0 }
  0x6c   :  { %791 = vmatpush3.bf16.msra.mxu1 %v869_v45  ;;  %v721_v45 = vld [vmem:[%s1216_s11] ss:$0 sm:$0xff] }
  0x6d   :  { %792 = vmatprep.subr.bf16.mxu1 %v985_v0 }
 0x122   :  { %v158_v8 = vpop.f32.mrb[0].mxu1 }
 0x123   :  { %v770_v9 = vpop.f32.mrb[1].mxu1 }
 0x124   :  { %v161_v10 = vpop.f32.mrb[2].mxu1 }
 0x125   :  { %v771_v11 = vpop.f32.mrb[3].mxu1 }
 0x12a   :  { %v221_v12 = vpop.f32.mrb[4].mxu1 }
 0x12b   :  { %v222_v14 = vadd.f32 %v221_v12, %v158_v8  ;;  %v778_v15 = vpop.f32.mrb[5].mxu1 }
 0x12c   :  { %v224_v16 = vpop.f32.mrb[6].mxu1  ;;  %v862_v15 = vld [vmem:[#allocation7 + $0x8] sm:$0xff]  }
 0x12d   :  { %v1155_v17 = vadd.f32 %v702_v13, %v222_v14  ;;  %v225_v18 = vadd.f32 %v224_v16, %v161_v10  ;;  %v779_v19 = vpop.f32.mrb[7].mxu1  ;;  %v864_v16 = vld [vmem:[#allocation7 + $0x10] sm:$0xff]  }
 0x12e   :  { %v870_v19 = vld [vmem:[#allocation7 + $0x28] sm:$0xff]  }
 0x12f   :  { %v1157_v20 = vadd.f32 %v702_v13, %v225_v18  ;;  %237 = vadd.xlane.f32.xlu0 %v1155_v17  ;;  %v241_v21 = vmul.f32 %v1155_v17, %v1155_v17  ;;  %v860_v13 = vld [vmem:[#allocation7] sm:$0xff]  }
 0x130   :  { %v868_v18 = vld [vmem:[#allocation7 + $0x20] sm:$0xff]  }
 0x131   :  { %243 = vadd.xlane.f32.xlu1 %v241_v21  ;;  %v242_v22 = vmul.f32 %v1157_v20, %v1157_v20  ;;  %v872_v21 = vld [vmem:[#allocation7 + $0x30] sm:$0xff]  }
 0x133   :  { %239 = vadd.xlane.f32.xlu0 %v1157_v20 }
 0x135   :  { %245 = vadd.xlane.f32.xlu1 %v242_v22  ;;  %v873_v22 = vld [vmem:[#allocation6 + $0x38] sm:$0xff]  }
 0x1bc   :  { %v238_v46 = vpop.xlane.xlu0 %237 }
 0x1bd   :  { %v247_v47 = vmul.f32 0.03125, %v238_v46  ;;  %v741_v46 = vunpack.c.l.bf16 %v740_v44 }
 0x1be   :  { %v244_v48 = vpop.xlane.xlu1 %243 }
 0x1bf   :  { %v251_v49 = vmul.f32 %v247_v47, %v247_v47  ;;  %v249_v50 = vmul.f32 0.03125, %v244_v48  ;;  %v257_v62 = vsub.f32 %v1155_v17, %v247_v47  ;;  %v866_v17 = vld [vmem:[#allocation7 + $0x18] sm:$0xff]  }
 0x1c0   :  { %v240_v51 = vpop.xlane.xlu0 %239  ;;  %v730_v48 = vld [vmem:[%s1218_s13] ss:$0 sm:$0xff] }
 0x1c1   :  { %v253_v52 = vsub.f32 %v249_v50, %v251_v49  ;;  %v248_v53 = vmul.f32 0.03125, %v240_v51 }
 0x1c2   :  { %v246_v54 = vpop.xlane.xlu1 %245 }
 0x1c3   :  { %v255_v55 = vmax.f32 %v253_v52, 0.0  ;;  %v252_v56 = vmul.f32 %v248_v53, %v248_v53  ;;  %v250_v57 = vmul.f32 0.03125, %v246_v54  ;;  %v258_v4 = vsub.f32 %v1157_v20, %v248_v53  ;;  %v871_v20 = vld [vmem:[#allocation6 + $0x30] sm:$0xff]  }
 0x1c4   :  { %793 = vmatpush3.bf16.msra.mxu1 %v871_v20  ;;  %v742_v52 = vunpack.c.h.bf16 %v740_v44 }
 0x1c5   :  { %v259_v58 = vadd.f32 1e-05, %v255_v55  ;;  %v254_v59 = vsub.f32 %v250_v57, %v252_v56  ;;  %794 = vmatprep.subr.bf16.mxu1 %v985_v0 }
 0x1c7   :  { %875 = vrsqrt.f32 %v259_v58  ;;  %v256_v60 = vmax.f32 %v254_v59, 0.0 }
 0x1c8   :  { %795 = vmatpush3.bf16.msra.mxu1 %v873_v22 }
 0x1c9   :  { %v260_v61 = vadd.f32 1e-05, %v256_v60 }
 0x1cb   :  { %877 = vrsqrt.f32 %v260_v61 }
 0x1d1   :  { %v876_v63 = vpop.eup %875 }
 0x1d2   :  { %v263_v2 = vmul.f32 %v876_v63, %v257_v62 }
 0x1d4   :  { %v272_v3 = vmul.f32 %v703_v1, %v263_v2 }
 0x1d5   :  { %v878_v6 = vpop.eup %877 }
 0x1d6   :  { %v264_v7 = vmul.f32 %v878_v6, %v258_v4  ;;  %v281_v8 = vadd.f32 %v704_v5, %v272_v3 }
 0x1d8   :  { %v273_v9 = vmul.f32 %v703_v1, %v264_v7  ;;  %879 = vtanh.f32 %v281_v8 }
 0x1da   :  { %v282_v10 = vadd.f32 %v704_v5, %v273_v9 }
 0x1dc   :  { %881 = vtanh.f32 %v282_v10 }
 0x1e2   :  { %v880_v11 = vpop.eup %879 }
 0x1e6   :  { %v882_v12 = vpop.eup %881 }
 0x1e7   :  { %v285_v14 = vpack.c.bf16 %v882_v12, %v880_v11 }
 0x1e9   :  { %427 = vmatmul.mubr.bf16.vlgmr.msra.gmra.mrb[0].mxu0 %v285_v14 }
 0x1ea   :  { %801 = vmatpush3.bf16.msra.mxu0 %v860_v13  ;;  %816 = vmatprep.mubr.msk.bf16.mxu0 %vm986_vm0, %v985_v0 }
 0x1eb   :  { %802 = vmatprep.subr.bf16.mxu0 %v985_v0 }
 0x1ee   :  { %803 = vmatpush3.bf16.msra.mxu0 %v862_v15 }
 0x1ef   :  { %804 = vmatprep.subr.bf16.mxu0 %v985_v0 }
 0x1f2   :  { %805 = vmatpush3.bf16.msra.mxu0 %v864_v16 }
 0x1f3   :  { %806 = vmatprep.subr.bf16.mxu0 %v985_v0 }
 0x1f6   :  { %807 = vmatpush3.bf16.msra.mxu0 %v866_v17 }
 0x1f7   :  { %808 = vmatprep.subr.bf16.mxu0 %v985_v0 }
 0x1fa   :  { %809 = vmatpush3.bf16.msra.mxu0 %v868_v18 }
 0x1fb   :  { %810 = vmatprep.subr.bf16.mxu0 %v985_v0 }
 0x1fe   :  { %811 = vmatpush3.bf16.msra.mxu0 %v870_v19 }
 0x1ff   :  { %812 = vmatprep.subr.bf16.mxu0 %v985_v0 }
 0x202   :  { %813 = vmatpush3.bf16.msra.mxu0 %v872_v21 }
 0x203   :  { %814 = vmatprep.subr.bf16.mxu0 %v985_v0 }
 0x206   :  { %815 = vmatpush3.bf16.msra.mxu0 %v874_v23 }
 0x2bc   :  { %v428_v31 = vpop.f32.mrb[0].mxu0 }
 0x2bd   :  { %v429_v32 = vadd.f32 %v428_v31, %v307_v29  ;;  %v430_v33 = vpop.f32.mrb[1].mxu0 }
 0x2be   :  { %v431_v34 = vadd.f32 %v430_v33, %v311_v30  ;;  %v432_v35 = vpop.f32.mrb[2].mxu0 }
 0x2bf   :  { %v433_v36 = vadd.f32 %v432_v35, %v307_v29  ;;  %v434_v0 = vpop.f32.mrb[3].mxu0  ;;  %v437_v38 = vmax.f32 %v429_v32, 0.0 }
 0x2c0   :  { %v435_v37 = vadd.f32 %v434_v0, %v311_v30  ;;  %v438_v40 = vmax.f32 %v431_v34, 0.0 }
 0x2c1   :  { %v439_v39 = vmax.f32 %v433_v36, 0.0 }
 0x2c2   :  { %v440_v41 = vmax.f32 %v435_v37, 0.0 }
 0x2c3   :  { %v441_v42 = vpack.c.bf16 %v439_v39, %v437_v38 }
 0x2c4   :  { %v442_v43 = vpack.c.bf16 %v440_v41, %v438_v40 }
 0x2c5   :  { %797 = vmatmul.mubr.bf16.vlgmr.msra.gmra.mrb[8].mxu1 %v441_v42 }
 0x2c6   :  { %817 = vmatmul.mubr.bf16.vlgmr.msra.gmra.mrb[4].mxu0 %v442_v43 }
 0x398   :  { %v548_v47 = vpop.f32.mrb[8].mxu1 }
 0x399   :  { %v549_v49 = vadd.f32 %v721_v45, %v548_v47  ;;  %v798_v50 = vpop.f32.mrb[9].mxu1  ;;  %v660_v51 = vpop.f32.mrb[4].mxu0 }
 0x39a   :  { %v551_v53 = vpop.f32.mrb[10].mxu1  ;;  %v818_v54 = vpop.f32.mrb[5].mxu0  ;;  %v661_v55 = vadd.f32 %v730_v48, %v660_v51 }
 0x39b   :  { %v552_v56 = vadd.f32 %v721_v45, %v551_v53  ;;  %v799_v57 = vpop.f32.mrb[11].mxu1  ;;  %v663_v58 = vpop.f32.mrb[6].mxu0  ;;  %v671_v59 = vmul.f32 %v741_v46, %v549_v49 }
 0x39c   :  { %v819_v60 = vpop.f32.mrb[7].mxu0  ;;  %v664_v61 = vadd.f32 %v730_v48, %v663_v58  ;;  %v677_v63 = vmul.f32 %v741_v46, %v661_v55 }
 0x39d   :  { %673 = vadd.xlane.f32.xlu0 %v671_v59  ;;  %v672_v62 = vmul.f32 %v742_v52, %v552_v56 }
 0x39e   :  { %v678_v1 = vmul.f32 %v742_v52, %v664_v61 }
 0x39f   :  { %675 = vadd.xlane.f32.xlu1 %v672_v62 }
 0x3a1   :  { %679 = vadd.xlane.f32.xlu0 %v677_v63 }
 0x3a3   :  { %681 = vadd.xlane.f32.xlu1 %v678_v1 }
 0x42a   :  { %v674_v2 = vpop.xlane.xlu0 %673 }
 0x42c   :  { %v676_v3 = vpop.xlane.xlu1 %675 }
 0x42e   :  { %v680_v4 = vpop.xlane.xlu0 %679 }
 0x42f   :  { %v684_v5 = vsel %vm683_vm5, %v674_v2, %v680_v4 }
 0x430   :  { %687 = vst.msk [vmem:[%s1219_s14] sm:$0xff] %vm686_vm6, %v684_v5  ;;  %v682_v6 = vpop.xlane.xlu1 %681 }
 0x431   :  { %v685_v7 = vsel %vm683_vm5, %v676_v3, %v682_v6 }
 0x432   :  { %688 = vst.msk [vmem:[%s1219_s14 + $0x8] sm:$0xff] %vm686_vm6, %v685_v7 }
 0x433   :  { %693 = vsyncpa [#allocation3], 1 }
 0x434   :  { %694 = vsyncpa [#allocation5], 1 }
 0x435   :  { %695 = vsyncpa [#allocation8], 1 }

</bundles_post_ra>
